<compile_context>
chip_gen: v7x
topology: tpu7x:2x2x1
jax: 0.10.0
libtpu: 0.0.40
codegen_flags: <defaults>
</compile_context>

<pallas_src>
import functools

import jax
import jax.numpy as jnp
from jax import lax
from jax.experimental import pallas as pl
from jax.experimental.pallas import tpu as pltpu


def _round_up(x, m):
    return (x + m - 1) // m * m


def _residual_block_kernel(x_ref, w1_ref, b1_ref, w2_ref, b2_ref, o_ref, *, H, W):
    # x_ref : (Cp, L)      L = NB*H*W; channels (zero-padded to Cp=8k) on sublanes,
    #                      flat (image, y, x) on lanes.
    # w*_ref: (Cp, 9*Cp)   fused conv weights, column block t*Cp:(t+1)*Cp = tap t=ky*3+kx.
    # b*_ref: (Cp, 1)      biases (zero-padded rows), broadcast along lanes.
    # o_ref : (Cp, L)
    Cp, L = x_ref.shape
    HW = H * W

    x = x_ref[...]

    # ---- Boundary masks: built ONCE, shared by both convs. ----------------------
    f = lax.broadcasted_iota(jnp.int32, (Cp, L), 1)
    # Within-image coordinates; power-of-two fast path avoids integer div/mod.
    hw = (f & (HW - 1)) if (HW & (HW - 1)) == 0 else (f % HW)
    if (W & (W - 1)) == 0:
        y_idx = hw >> (W.bit_length() - 1)
        x_idx = hw & (W - 1)
    else:
        y_idx = hw // W
        x_idx = hw - y_idx * W

    top_ok = y_idx >= 1
    bot_ok = y_idx < H - 1
    left_ok = x_idx >= 1
    right_ok = x_idx < W - 1

    # (lane shift, validity mask) per tap, tap order = ky*3 + kx (dy=ky-1, dx=kx-1).
    # Rolling the whole (image-major) lane axis is safe: any value pulled across an
    # image boundary lands only on lanes the mask zeroes anyway.
    taps_meta = []
    for dy, row_m in ((-1, top_ok), (0, None), (1, bot_ok)):
        for dx, col_m in ((-1, left_ok), (0, None), (1, right_ok)):
            shift = (-(dy * W + dx)) % L
            if row_m is None:
                m = col_m
            elif col_m is None:
                m = row_m
            else:
                m = row_m & col_m
            taps_meta.append((shift, m))

    def conv3x3(inp, w, b):
        # Gather the 9 shifted/masked neighbour planes, stack on sublanes (8-aligned
        # pieces), and run a single wide-contraction MXU matmul.
        pieces = []
        for shift, m in taps_meta:
            t = pltpu.roll(inp, shift=shift, axis=1) if shift else inp
            if m is not None:
                t = jnp.where(m, t, 0.0)
            pieces.append(t)
        stacked = jnp.concatenate(pieces, axis=0)                      # (9*Cp, L)
        out = jnp.dot(w, stacked, preferred_element_type=jnp.float32)  # (Cp, L)
        return out + b                                                 # bias bcast

    w1 = w1_ref[...]
    b1 = b1_ref[...]
    w2 = w2_ref[...]
    b2 = b2_ref[...]

    y1 = jnp.maximum(conv3x3(x, w1, b1), 0.0)        # relu(conv1(x))
    y2 = conv3x3(y1, w2, b2)                         # conv2(y1)
    o_ref[...] = jnp.maximum(x + y2, 0.0).astype(o_ref.dtype)   # relu(x + y2), one store


def _pack_weights(w_pt, Cp):
    """PyTorch (Cout, Cin, 3, 3) -> fused (Cp, 9*Cp); column t*Cp + cin = tap t, ch cin."""
    C = w_pt.shape[0]
    w = jnp.transpose(w_pt, (0, 2, 3, 1))                             # (Cout, ky, kx, Cin)
    w = jnp.pad(w, ((0, Cp - C), (0, 0), (0, 0), (0, Cp - C)))
    return w.reshape(Cp, 9 * Cp)


def _pick_images_per_step(N, HW, target_lanes=512):
    """Fold NB images onto the lane axis per grid step (aim for >= target_lanes)."""
    for nb in range(1, N + 1):
        if N % nb:
            continue
        if (nb * HW) % 128 != 0 and nb != N:
            continue                       # keep lane blocks 128-aligned unless full batch
        if nb * HW >= target_lanes:
            return nb
    return N


def residual_block_pallas(x_nchw, w1_pt, b1, w2_pt, b2):
    """x_nchw: (N, C, H, W) f32.  w*_pt: (C, C, 3, 3) PyTorch layout.  b*: (C,)."""
    N, C, H, W = x_nchw.shape
    HW = H * W
    Cp = _round_up(C, 8)          # pad channels to a full sublane group (aligned stacking)

    # Layout plumbing (tiny XLA ops): channel-major, lane axis = (image, y, x) flattened.
    x_cl = x_nchw.reshape(N, C, HW).transpose(1, 0, 2).reshape(C, N * HW)
    x_p = jnp.pad(x_cl, ((0, Cp - C), (0, 0)))

    w1_2d = _pack_weights(w1_pt, Cp)
    w2_2d = _pack_weights(w2_pt, Cp)
    b1_col = jnp.pad(b1.reshape(C, 1), ((0, Cp - C), (0, 0)))
    b2_col = jnp.pad(b2.reshape(C, 1), ((0, Cp - C), (0, 0)))

    NB = _pick_images_per_step(N, HW)
    L_blk = NB * HW
    grid = (N // NB,)

    kernel = functools.partial(_residual_block_kernel, H=H, W=W)

    out_p = pl.pallas_call(
        kernel,
        out_shape=jax.ShapeDtypeStruct((Cp, N * HW), jnp.float32),
        grid_spec=pltpu.PrefetchScalarGridSpec(
            num_scalar_prefetch=0,
            grid=grid,
            in_specs=[
                pl.BlockSpec((Cp, L_blk), lambda b: (0, b)),       # x (NB images / step)
                pl.BlockSpec((Cp, 9 * Cp), lambda b: (0, 0)),      # fused conv1 weights
                pl.BlockSpec((Cp, 1), lambda b: (0, 0)),           # conv1 bias
                pl.BlockSpec((Cp, 9 * Cp), lambda b: (0, 0)),      # fused conv2 weights
                pl.BlockSpec((Cp, 1), lambda b: (0, 0)),           # conv2 bias
            ],
            out_specs=pl.BlockSpec((Cp, L_blk), lambda b: (0, b)),
        ),
        compiler_params=pltpu.CompilerParams(
            dimension_semantics=("parallel",)),
    )(x_p, w1_2d, b1_col, w2_2d, b2_col)

    # Undo the layout plumbing (drop padded channel rows, back to NCHW).
    return out_p[:C].reshape(C, N, HW).transpose(1, 0, 2).reshape(N, C, H, W)


def _reference(x_nchw, w1_pt, b1, w2_pt, b2):
    """Pure-JAX reference (lax conv, NCHW) mirroring the PyTorch forward."""
    dn = lax.conv_dimension_numbers(x_nchw.shape, w1_pt.shape,
                                    ("NCHW", "OIHW", "NCHW"))
    y = lax.conv_general_dilated(x_nchw, w1_pt, (1, 1), ((1, 1), (1, 1)),
                                 dimension_numbers=dn)
    y = jax.nn.relu(y + b1.reshape(1, -1, 1, 1))
    y = lax.conv_general_dilated(y, w2_pt, (1, 1), ((1, 1), (1, 1)),
                                 dimension_numbers=dn)
    y = y + b2.reshape(1, -1, 1, 1)
    return jax.nn.relu(x_nchw + y)


if __name__ == "__main__":
    N, C, H, W = 2, 4, 16, 16

    key = jax.random.PRNGKey(0)
    kx, kw1, kb1, kw2, kb2 = jax.random.split(key, 5)

    # deterministic parameter init (shapes per nn.Conv2d(channels, channels, 3, padding=1))
    x = jax.random.normal(kx, (N, C, H, W), dtype=jnp.float32)
    w1 = jax.random.normal(kw1, (C, C, 3, 3), dtype=jnp.float32) * 0.1
    b1 = jax.random.normal(kb1, (C,), dtype=jnp.float32) * 0.1
    w2 = jax.random.normal(kw2, (C, C, 3, 3), dtype=jnp.float32) * 0.1
    b2 = jax.random.normal(kb2, (C,), dtype=jnp.float32) * 0.1

    out = residual_block_pallas(x, w1, b1, w2, b2)
    out = jax.block_until_ready(out)

    ref = _reference(x, w1, b1, w2, b2)
    assert out.shape == (N, C, H, W)
    assert jnp.allclose(out, ref, atol=1e-4, rtol=1e-4), "mismatch vs reference"

    print("KERNEL_OK")
</pallas_src>

<mosaic_0001>
module attributes {stable_mosaic.version = 11 : i64} {
  func.func @_residual_block_kernel(%arg0: i32, %arg1: memref<8x512xf32, #tpu.memory_space<vmem>>, %arg2: memref<8x72xf32, #tpu.memory_space<vmem>>, %arg3: memref<8x1xf32, #tpu.memory_space<vmem>>, %arg4: memref<8x72xf32, #tpu.memory_space<vmem>>, %arg5: memref<8x1xf32, #tpu.memory_space<vmem>>, %arg6: memref<8x512xf32, #tpu.memory_space<vmem>>) attributes {dimension_semantics = [#tpu.dimension_semantics<parallel>], iteration_bounds = array<i64: 1>, scalar_prefetch = 0 : i64, scratch_operands = 0 : i64, tpu.core_type = #tpu.core_type<tc>, window_params = [{transform_indices = @transform_0, window_bounds = array<i64: 8, 512>}, {pipeline_mode = #tpu.pipeline_mode<synchronous>, transform_indices = @transform_1, window_bounds = array<i64: 8, 72>}, {pipeline_mode = #tpu.pipeline_mode<synchronous>, transform_indices = @transform_2, window_bounds = array<i64: 8, 1>}, {pipeline_mode = #tpu.pipeline_mode<synchronous>, transform_indices = @transform_3, window_bounds = array<i64: 8, 72>}, {pipeline_mode = #tpu.pipeline_mode<synchronous>, transform_indices = @transform_4, window_bounds = array<i64: 8, 1>}, {transform_indices = @transform_5, window_bounds = array<i64: 8, 512>}]} {
    %c0 = arith.constant 0 : index
    %c0_0 = arith.constant 0 : index
    %0 = vector.load %arg1[%c0, %c0_0] : memref<8x512xf32, #tpu.memory_space<vmem>>, vector<8x512xf32>
    %1 = tpu.iota {dimensions = array<i32: 1>} : vector<8x512xi32>
    %c255_i32 = arith.constant 255 : i32
    %2 = vector.broadcast %c255_i32 : i32 to vector<8x512xi32>
    %3 = arith.andi %1, %2 : vector<8x512xi32>
    %c4_i32 = arith.constant 4 : i32
    %4 = vector.broadcast %c4_i32 : i32 to vector<8x512xi32>
    %5 = arith.shrsi %3, %4 : vector<8x512xi32>
    %c15_i32 = arith.constant 15 : i32
    %6 = vector.broadcast %c15_i32 : i32 to vector<8x512xi32>
    %7 = arith.andi %3, %6 : vector<8x512xi32>
    %c1_i32 = arith.constant 1 : i32
    %8 = vector.broadcast %c1_i32 : i32 to vector<8x512xi32>
    %9 = arith.cmpi sge, %5, %8 : vector<8x512xi32>
    %c15_i32_1 = arith.constant 15 : i32
    %10 = vector.broadcast %c15_i32_1 : i32 to vector<8x512xi32>
    %11 = arith.cmpi slt, %5, %10 : vector<8x512xi32>
    %c1_i32_2 = arith.constant 1 : i32
    %12 = vector.broadcast %c1_i32_2 : i32 to vector<8x512xi32>
    %13 = arith.cmpi sge, %7, %12 : vector<8x512xi32>
    %c15_i32_3 = arith.constant 15 : i32
    %14 = vector.broadcast %c15_i32_3 : i32 to vector<8x512xi32>
    %15 = arith.cmpi slt, %7, %14 : vector<8x512xi32>
    %16 = arith.andi %9, %13 : vector<8x512xi1>
    %17 = arith.andi %9, %15 : vector<8x512xi1>
    %18 = arith.andi %11, %13 : vector<8x512xi1>
    %19 = arith.andi %11, %15 : vector<8x512xi1>
    %c0_4 = arith.constant 0 : index
    %c0_5 = arith.constant 0 : index
    %20 = vector.load %arg2[%c0_4, %c0_5] : memref<8x72xf32, #tpu.memory_space<vmem>>, vector<8x72xf32>
    %c0_6 = arith.constant 0 : index
    %c0_7 = arith.constant 0 : index
    %21 = vector.load %arg3[%c0_6, %c0_7] : memref<8x1xf32, #tpu.memory_space<vmem>>, vector<8x1xf32>
    %c0_8 = arith.constant 0 : index
    %c0_9 = arith.constant 0 : index
    %22 = vector.load %arg4[%c0_8, %c0_9] : memref<8x72xf32, #tpu.memory_space<vmem>>, vector<8x72xf32>
    %c0_10 = arith.constant 0 : index
    %c0_11 = arith.constant 0 : index
    %23 = vector.load %arg5[%c0_10, %c0_11] : memref<8x1xf32, #tpu.memory_space<vmem>>, vector<8x1xf32>
    %c17_i32 = arith.constant 17 : i32
    %24 = tpu.dynamic_rotate %0 by %c17_i32 dim 1 : vector<8x512xf32>, i32 -> vector<8x512xf32>
    %cst = arith.constant 0.000000e+00 : f32
    %25 = vector.broadcast %cst : f32 to vector<8x512xf32>
    %26 = arith.select %16, %24, %25 : vector<8x512xi1>, vector<8x512xf32>
    %c16_i32 = arith.constant 16 : i32
    %27 = tpu.dynamic_rotate %0 by %c16_i32 dim 1 : vector<8x512xf32>, i32 -> vector<8x512xf32>
    %cst_12 = arith.constant 0.000000e+00 : f32
    %28 = vector.broadcast %cst_12 : f32 to vector<8x512xf32>
    %29 = arith.select %9, %27, %28 : vector<8x512xi1>, vector<8x512xf32>
    %c15_i32_13 = arith.constant 15 : i32
    %30 = tpu.dynamic_rotate %0 by %c15_i32_13 dim 1 : vector<8x512xf32>, i32 -> vector<8x512xf32>
    %cst_14 = arith.constant 0.000000e+00 : f32
    %31 = vector.broadcast %cst_14 : f32 to vector<8x512xf32>
    %32 = arith.select %17, %30, %31 : vector<8x512xi1>, vector<8x512xf32>
    %c1_i32_15 = arith.constant 1 : i32
    %33 = tpu.dynamic_rotate %0 by %c1_i32_15 dim 1 : vector<8x512xf32>, i32 -> vector<8x512xf32>
    %cst_16 = arith.constant 0.000000e+00 : f32
    %34 = vector.broadcast %cst_16 : f32 to vector<8x512xf32>
    %35 = arith.select %13, %33, %34 : vector<8x512xi1>, vector<8x512xf32>
    %c511_i32 = arith.constant 511 : i32
    %36 = tpu.dynamic_rotate %0 by %c511_i32 dim 1 : vector<8x512xf32>, i32 -> vector<8x512xf32>
    %cst_17 = arith.constant 0.000000e+00 : f32
    %37 = vector.broadcast %cst_17 : f32 to vector<8x512xf32>
    %38 = arith.select %15, %36, %37 : vector<8x512xi1>, vector<8x512xf32>
    %c497_i32 = arith.constant 497 : i32
    %39 = tpu.dynamic_rotate %0 by %c497_i32 dim 1 : vector<8x512xf32>, i32 -> vector<8x512xf32>
    %cst_18 = arith.constant 0.000000e+00 : f32
    %40 = vector.broadcast %cst_18 : f32 to vector<8x512xf32>
    %41 = arith.select %18, %39, %40 : vector<8x512xi1>, vector<8x512xf32>
    %c496_i32 = arith.constant 496 : i32
    %42 = tpu.dynamic_rotate %0 by %c496_i32 dim 1 : vector<8x512xf32>, i32 -> vector<8x512xf32>
    %cst_19 = arith.constant 0.000000e+00 : f32
    %43 = vector.broadcast %cst_19 : f32 to vector<8x512xf32>
    %44 = arith.select %11, %42, %43 : vector<8x512xi1>, vector<8x512xf32>
    %c495_i32 = arith.constant 495 : i32
    %45 = tpu.dynamic_rotate %0 by %c495_i32 dim 1 : vector<8x512xf32>, i32 -> vector<8x512xf32>
    %cst_20 = arith.constant 0.000000e+00 : f32
    %46 = vector.broadcast %cst_20 : f32 to vector<8x512xf32>
    %47 = arith.select %19, %45, %46 : vector<8x512xi1>, vector<8x512xf32>
    %48 = tpu.concatenate %26, %29, %32, %35, %0, %38, %41, %44, %47 in 0 : vector<8x512xf32>, vector<8x512xf32>, vector<8x512xf32>, vector<8x512xf32>, vector<8x512xf32>, vector<8x512xf32>, vector<8x512xf32>, vector<8x512xf32>, vector<8x512xf32> -> vector<72x512xf32>
    %cst_21 = arith.constant dense<0.000000e+00> : vector<8x512xf32>
    %49 = tpu.matmul %20, %48, %cst_21 {dimension_numbers = #tpu.dot_dimension_numbers<[1], [0], [0], [1], [0, 0, 1, 1], [], []>} : vector<8x72xf32>, vector<72x512xf32>, vector<8x512xf32> -> vector<8x512xf32>
    %50 = vector.broadcast %21 : vector<8x1xf32> to vector<8x512xf32>
    %51 = arith.addf %49, %50 : vector<8x512xf32>
    %cst_22 = arith.constant 0.000000e+00 : f32
    %52 = vector.broadcast %cst_22 : f32 to vector<8x512xf32>
    %53 = arith.maximumf %51, %52 : vector<8x512xf32>
    %c17_i32_23 = arith.constant 17 : i32
    %54 = tpu.dynamic_rotate %53 by %c17_i32_23 dim 1 : vector<8x512xf32>, i32 -> vector<8x512xf32>
    %cst_24 = arith.constant 0.000000e+00 : f32
    %55 = vector.broadcast %cst_24 : f32 to vector<8x512xf32>
    %56 = arith.select %16, %54, %55 : vector<8x512xi1>, vector<8x512xf32>
    %c16_i32_25 = arith.constant 16 : i32
    %57 = tpu.dynamic_rotate %53 by %c16_i32_25 dim 1 : vector<8x512xf32>, i32 -> vector<8x512xf32>
    %cst_26 = arith.constant 0.000000e+00 : f32
    %58 = vector.broadcast %cst_26 : f32 to vector<8x512xf32>
    %59 = arith.select %9, %57, %58 : vector<8x512xi1>, vector<8x512xf32>
    %c15_i32_27 = arith.constant 15 : i32
    %60 = tpu.dynamic_rotate %53 by %c15_i32_27 dim 1 : vector<8x512xf32>, i32 -> vector<8x512xf32>
    %cst_28 = arith.constant 0.000000e+00 : f32
    %61 = vector.broadcast %cst_28 : f32 to vector<8x512xf32>
    %62 = arith.select %17, %60, %61 : vector<8x512xi1>, vector<8x512xf32>
    %c1_i32_29 = arith.constant 1 : i32
    %63 = tpu.dynamic_rotate %53 by %c1_i32_29 dim 1 : vector<8x512xf32>, i32 -> vector<8x512xf32>
    %cst_30 = arith.constant 0.000000e+00 : f32
    %64 = vector.broadcast %cst_30 : f32 to vector<8x512xf32>
    %65 = arith.select %13, %63, %64 : vector<8x512xi1>, vector<8x512xf32>
    %c511_i32_31 = arith.constant 511 : i32
    %66 = tpu.dynamic_rotate %53 by %c511_i32_31 dim 1 : vector<8x512xf32>, i32 -> vector<8x512xf32>
    %cst_32 = arith.constant 0.000000e+00 : f32
    %67 = vector.broadcast %cst_32 : f32 to vector<8x512xf32>
    %68 = arith.select %15, %66, %67 : vector<8x512xi1>, vector<8x512xf32>
    %c497_i32_33 = arith.constant 497 : i32
    %69 = tpu.dynamic_rotate %53 by %c497_i32_33 dim 1 : vector<8x512xf32>, i32 -> vector<8x512xf32>
    %cst_34 = arith.constant 0.000000e+00 : f32
    %70 = vector.broadcast %cst_34 : f32 to vector<8x512xf32>
    %71 = arith.select %18, %69, %70 : vector<8x512xi1>, vector<8x512xf32>
    %c496_i32_35 = arith.constant 496 : i32
    %72 = tpu.dynamic_rotate %53 by %c496_i32_35 dim 1 : vector<8x512xf32>, i32 -> vector<8x512xf32>
    %cst_36 = arith.constant 0.000000e+00 : f32
    %73 = vector.broadcast %cst_36 : f32 to vector<8x512xf32>
    %74 = arith.select %11, %72, %73 : vector<8x512xi1>, vector<8x512xf32>
    %c495_i32_37 = arith.constant 495 : i32
    %75 = tpu.dynamic_rotate %53 by %c495_i32_37 dim 1 : vector<8x512xf32>, i32 -> vector<8x512xf32>
    %cst_38 = arith.constant 0.000000e+00 : f32
    %76 = vector.broadcast %cst_38 : f32 to vector<8x512xf32>
    %77 = arith.select %19, %75, %76 : vector<8x512xi1>, vector<8x512xf32>
    %78 = tpu.concatenate %56, %59, %62, %65, %53, %68, %71, %74, %77 in 0 : vector<8x512xf32>, vector<8x512xf32>, vector<8x512xf32>, vector<8x512xf32>, vector<8x512xf32>, vector<8x512xf32>, vector<8x512xf32>, vector<8x512xf32>, vector<8x512xf32> -> vector<72x512xf32>
    %cst_39 = arith.constant dense<0.000000e+00> : vector<8x512xf32>
    %79 = tpu.matmul %22, %78, %cst_39 {dimension_numbers = #tpu.dot_dimension_numbers<[1], [0], [0], [1], [0, 0, 1, 1], [], []>} : vector<8x72xf32>, vector<72x512xf32>, vector<8x512xf32> -> vector<8x512xf32>
    %80 = vector.broadcast %23 : vector<8x1xf32> to vector<8x512xf32>
    %81 = arith.addf %79, %80 : vector<8x512xf32>
    %82 = arith.addf %0, %81 : vector<8x512xf32>
    %cst_40 = arith.constant 0.000000e+00 : f32
    %83 = vector.broadcast %cst_40 : f32 to vector<8x512xf32>
    %84 = arith.maximumf %82, %83 : vector<8x512xf32>
    %c0_41 = arith.constant 0 : index
    %c0_42 = arith.constant 0 : index
    %85 = vector.load %arg6[%c0_41, %c0_42] : memref<8x512xf32, #tpu.memory_space<vmem>>, vector<8x512xf32>
    tpu.vector_store %arg6[%c0_41, %c0_42], %84 {strides = array<i32>} : memref<8x512xf32, #tpu.memory_space<vmem>>, vector<8x512xf32>,
    return
  }
  func.func @transform_0(%arg0: i32) -> (i32, i32) {
    %c0_i32 = arith.constant 0 : i32
    %c0_i32_0 = arith.constant 0 : i32
    return %c0_i32, %arg0 : i32, i32
  }
  func.func @transform_1(%arg0: i32) -> (i32, i32) {
    %c0_i32 = arith.constant 0 : i32
    %c0_i32_0 = arith.constant 0 : i32
    %c0_i32_1 = arith.constant 0 : i32
    return %c0_i32, %c0_i32_0 : i32, i32
  }
  func.func @transform_2(%arg0: i32) -> (i32, i32) {
    %c0_i32 = arith.constant 0 : i32
    %c0_i32_0 = arith.constant 0 : i32
    %c0_i32_1 = arith.constant 0 : i32
    return %c0_i32, %c0_i32_0 : i32, i32
  }
  func.func @transform_3(%arg0: i32) -> (i32, i32) {
    %c0_i32 = arith.constant 0 : i32
    %c0_i32_0 = arith.constant 0 : i32
    %c0_i32_1 = arith.constant 0 : i32
    return %c0_i32, %c0_i32_0 : i32, i32
  }
  func.func @transform_4(%arg0: i32) -> (i32, i32) {
    %c0_i32 = arith.constant 0 : i32
    %c0_i32_0 = arith.constant 0 : i32
    %c0_i32_1 = arith.constant 0 : i32
    return %c0_i32, %c0_i32_0 : i32, i32
  }
  func.func @transform_5(%arg0: i32) -> (i32, i32) {
    %c0_i32 = arith.constant 0 : i32
    %c0_i32_0 = arith.constant 0 : i32
    return %c0_i32, %arg0 : i32, i32
  }
}

</mosaic_0001>

<bundles_post_ra>
// kernel: tpu_custom_call.1
= control target key start
LH: loop header
LB: loop body
LE: loop exit
PB: predicated region body
PF: predicated region fallthrough
CT: control target
= control target key end

     0   :  { %10 = vsyncpa [#allocation3], 0  ;;  %s1707_s0 = inlined_call_operand.hbm [shape: f32[8,512], index: 0, kind: input, shape index: {}]   ;;  %s1708_s1 = inlined_call_operand.vmem [shape: f32[8,72], index: 1, kind: input, shape index: {}]   ;;  %s1709_s2 = inlined_call_operand.vmem [shape: f32[8,1], index: 2, kind: input, shape index: {}]   ;;  %s1710_s3 = inlined_call_operand.vmem [shape: f32[8,72], index: 3, kind: input, shape index: {}]   ;;  %s1711_s4 = inlined_call_operand.vmem [shape: f32[8,1], index: 4, kind: input, shape index: {}]   ;;  %s1712_s5 = inlined_call_operand.hbm [shape: f32[8,512], index: 5, kind: output, shape index: {}]  }
   0x1   :  { %11 = vsyncpa [#allocation4], 0  ;;  %s1052_s18 = smov [#allocation2]   ;;  %s1004_s22 = scalar_lea.hbm %s1707_s0, 512 }
   0x2   :  { %s18_s19 = sshll.u32 %s1052_s18, 4  ;;  %p1005_p0 = scmp.ne.s32.totalorder %s1707_s0, %s1004_s22  ;;  %s19_s19 = int_to_ptr.vmem [resolvable:$true] %s18_s19 }
   0x3   :  { %p1008_p1 = scmp.lt.u32.totalorder %s1004_s22, %s1707_s0 }
   0x5   :  { %p1010_p2 = pnand %p1008_p1, %p1005_p0 }
   0x7   :  { %1013 = shalt.err (!%p1010_p2)
}
   0x8   :  { %s1014_s27 = scalar_lea.vmem %s19_s19, 512  ;;  %p1019_p4 = scmp.lt.s32.totalorder %s19_s19, %s19_s19 }
   0x9   :  { %p1015_p3 = scmp.ne.s32.totalorder %s19_s19, %s1014_s27  ;;  %p1020_p5 = scmp.lt.s32.totalorder %s1014_s27, %s1014_s27 }
   0xb   :  { %p1021_p6 = por %p1020_p5, %p1019_p4 }
   0xd   :  { %p1022_p7 = pnand %p1021_p6, %p1015_p3 }
   0xf   :  { %1025 = shalt.err (!%p1022_p7)
}
  0x10   :  { %21 = dma.hbm_to_vmem [thread:$0]  %s1707_s0, 512, %s19_s19, [#allocation3]  }
  0x11   :  { %1048 = dma.done.wait [#allocation3], 512  }
  0x12   :  { %1049 = vsyncadd [#allocation3], 4294966784  ;;  %v1107_v0 = vld [vmem:[#allocation2] sm:$0xff]  ;;  %v1109_v1 = vld [vmem:[#allocation2 + $0x8] sm:$0xff]  ;;  %s1053_s30 = smov 16   ;;  %s1054_s6 = smov 17   ;;  %v37_v9 = vlaneseq }
  0x13   :  { %v1111_v2 = vld [vmem:[#allocation2 + $0x10] sm:$0xff]  ;;  %v873_v3 = vpack.i.bf16 %v1109_v1, %v1107_v0  ;;  %v1115_v4 = vld [vmem:[#allocation2 + $0x18] sm:$0xff]  ;;  %s1055_s0 = smov 15   ;;  %s1056_s7 = smov 1   ;;  %v1059_v6 = vmov 0.0   ;;  %v1060_v7 = vmov 0  }
  0x14   :  { %v878_v5 = vpack.i.bf16 %v1115_v4, %v1111_v2  ;;  %s1057_s8 = smov 127   ;;  %s1058_s9 = smov 113   ;;  %299 = vmatprep.mubr.f32.mxu0 %v1059_v6  ;;  %370 = vmatprep.mubr.f32.mxu1 %v1059_v6  ;;  %v87_v8 = vld [vmem:[%s1709_s2] sm:$0xff]  ;;  %v1146_v10 = vand.u32 127, %v37_v9 }
  0x15   :  { %874 = vrot.lane.b32.xlu1 %v873_v3, %s1053_s30  ;;  %864 = vrot.lane.b32.xlu0 %v873_v3, %s1054_s6  ;;  %s1061_s10 = smov 112   ;;  %s1062_s11 = smov 111  }
  0x16   :  { %933 = vset.pattern.permute.xlu0 %v1060_v7  ;;  %v39_v11 = vadd.s32 128, %v1146_v10  ;;  %v41_v12 = vadd.s32 384, %v1146_v10  ;;  %v42_v14 = vand.u32 255, %v1146_v10  ;;  %v40_v16 = vadd.s32 256, %v1146_v10 }
  0x17   :  { %vm1716_vm7 = vcmp.lt.s32.totalorder %v1146_v10, 17  ;;  %vm1717_vm8 = vcmp.lt.s32.totalorder %v1146_v10, 16 }
  0x18   :  { %v43_v13 = vand.u32 255, %v39_v11  ;;  %v45_v15 = vand.u32 255, %v41_v12  ;;  %v1156_v19 = vshra.s32 %v42_v14, 4  ;;  %v1158_v20 = vand.u32 15, %v42_v14 }
  0x19   :  { %879 = vrot.lane.b32.xlu1 %v878_v5, %s1053_s30  ;;  %869 = vrot.lane.b32.xlu0 %v878_v5, %s1054_s6  ;;  %v44_v23 = vand.u32 255, %v40_v16 }
  0x1a   :  { %v1152_v17 = vshra.s32 %v43_v13, 4  ;;  %v1154_v18 = vand.u32 15, %v43_v13  ;;  %v1160_v21 = vshra.s32 %v45_v15, 4  ;;  %v1162_v22 = vand.u32 15, %v45_v15 }
  0x1b   :  { %vm54_vm2 = vcmp.ge.s32.totalorder %v1156_v19, 1  ;;  %vm1713_vm3 = vcmp.ge.s32.totalorder %v1158_v20, 1  ;;  %v1170_v24 = vshra.s32 %v44_v23, 4  ;;  %v1172_v25 = vand.u32 15, %v44_v23 }
  0x1c   :  { %vm55_vm0 = vcmp.ge.s32.totalorder %v1152_v17, 1  ;;  %vm1719_vm1 = vcmp.ge.s32.totalorder %v1154_v18, 1  ;;  %vm57_vm4 = vcmp.ge.s32.totalorder %v1160_v21, 1  ;;  %vm1718_vm5 = vcmp.ge.s32.totalorder %v1162_v22, 1  ;;  %vm70_vm9 = vmand %vm54_vm2, %vm1713_vm3 }
  0x1d   :  { %889 = vrot.lane.b32.xlu1 %v878_v5, %s1055_s0  ;;  %884 = vrot.lane.b32.xlu0 %v873_v3, %s1055_s0  ;;  %vm71_vm6 = vmand %vm55_vm0, %vm1719_vm1  ;;  %vm56_vm12 = vcmp.ge.s32.totalorder %v1170_v24, 1  ;;  %vm1714_vm13 = vcmp.ge.s32.totalorder %v1172_v25, 1  ;;  %vm1715_vm15 = vcmp.lt.s32.totalorder %v1154_v18, 15  ;;  %vm1720_vm3 = vcmp.lt.s32.totalorder %v1162_v22, 15 }
  0x1e   :  { %vm1188_vm10 = vmand %vm57_vm4, %vm1718_vm5  ;;  %vm1723_vm5 = vcmp.lt.s32.totalorder %v1146_v10, 1 }
  0x1f   :  { %vm1198_vm11 = vmpackc.low %vm55_vm0, %vm71_vm6 }
  0x20   :  { %vm1206_vm14 = vmpackc.low %vm54_vm2, %vm70_vm9 }
  0x21   :  { %899 = vrot.lane.b32.xlu1 %v878_v5, %s1056_s7  ;;  %894 = vrot.lane.b32.xlu0 %v873_v3, %s1056_s7  ;;  %vm1215_vm6 = vmpackc.low %vm57_vm4, %vm1188_vm10 }
  0x22   :  { %vm72_vm9 = vmand %vm56_vm12, %vm1714_vm13 }
  0x23   :  { %vm1238_vm10 = vmand %vm55_vm0, %vm1715_vm15  ;;  %vm1724_vm0 = vcmp.lt.s32.totalorder %v1158_v20, 15  ;;  %vm1722_vm15 = vcmp.lt.s32.totalorder %v1172_v25, 15 }
  0x24   :  { %vm1248_vm13 = vmpackc.low %vm56_vm12, %vm72_vm9 }
  0x25   :  { %909 = vrot.lane.b32.xlu1 %v878_v5, %s1057_s8  ;;  %904 = vrot.lane.b32.xlu0 %v873_v3, %s1057_s8  ;;  %vm1262_vm9 = vmpackc.low %vm1719_vm1, %vm1238_vm10  ;;  %vm1725_vm10 = vcmp.lt.s32.totalorder %v1146_v10, 127 }
  0x26   :  { %vm1283_vm1 = vmand %vm54_vm2, %vm1724_vm0  ;;  %vm1758_vm2 = vcmp.ge.s32.totalorder %v1162_v22, 1  ;;  %vm1779_vm0 = vcmp.lt.s32.totalorder %v1172_v25, 15 }
  0x29   :  { %919 = vrot.lane.b32.xlu1 %v878_v5, %s1058_s9  ;;  %914 = vrot.lane.b32.xlu0 %v873_v3, %s1058_s9 }
  0x2d   :  { %929 = vrot.lane.b32.xlu1 %v878_v5, %s1061_s10  ;;  %924 = vrot.lane.b32.xlu0 %v873_v3, %s1061_s10 }
  0x31   :  { %211 = vrot.lane.b32.xlu1 %v1109_v1, %s1062_s11  ;;  %209 = vrot.lane.b32.xlu0 %v1107_v0, %s1062_s11 }
  0x35   :  { %215 = vrot.lane.b32.xlu1 %v1115_v4, %s1062_s11  ;;  %213 = vrot.lane.b32.xlu0 %v1111_v2, %s1062_s11 }
  0x39   :  { %228 = vperm.xlu0 %933, %v87_v8  }
  0x87   :  { %v875_v26 = vpop.permute.xlu1 %874  ;;  %v865_v27 = vpop.permute.xlu0 %864 }
  0x88   :  { %v877_v28 = vunpack.i.h.bf16 %v875_v26  ;;  %v876_v29 = vunpack.i.l.bf16 %v875_v26  ;;  %v867_v30 = vunpack.i.h.bf16 %v865_v27  ;;  %v866_v31 = vunpack.i.l.bf16 %v865_v27 }
  0x89   :  { %v1759_v26 = vmov 0 }
  0x8a   :  { %v101_v33 = vsel %vm1716_vm7, %v866_v31, %v867_v30  ;;  %v118_v34 = vsel %vm1717_vm8, %v876_v29, %v877_v28 }
  0x8b   :  { %v880_v36 = vpop.permute.xlu1 %879  ;;  %v870_v37 = vpop.permute.xlu0 %869  ;;  %v754_v38 = vpack.c.bf16 %v118_v34, %v101_v33 }
  0x8c   :  { %v882_v40 = vunpack.i.h.bf16 %v880_v36  ;;  %v881_v41 = vunpack.i.l.bf16 %v880_v36  ;;  %v872_v42 = vunpack.i.h.bf16 %v870_v37  ;;  %v871_v43 = vunpack.i.l.bf16 %v870_v37 }
  0x8d   :  { %756 = vmatprep.subr.msk.bf16.mxu0 %vm1198_vm11, %v754_v38 }
  0x8e   :  { %v102_v45 = vsel %vm1716_vm7, %v872_v42, %v866_v31  ;;  %v119_v46 = vsel %vm1717_vm8, %v882_v40, %v876_v29  ;;  %v99_v47 = vsel %vm1716_vm7, %v871_v43, %v872_v42  ;;  %v116_v48 = vsel %vm1717_vm8, %v881_v41, %v882_v40 }
  0x8f   :  { %v890_v50 = vpop.permute.xlu1 %889  ;;  %v885_v51 = vpop.permute.xlu0 %884  ;;  %v757_v52 = vpack.c.bf16 %v119_v46, %v102_v45  ;;  %v778_v53 = vpack.c.bf16 %v116_v48, %v99_v47  ;;  %v100_v54 = vsel %vm1716_vm7, %v867_v30, %v871_v43  ;;  %v117_v55 = vsel %vm1717_vm8, %v877_v28, %v881_v41  ;;  %vm1271_vm8 = vmand %vm57_vm4, %vm1720_vm3 }
  0x90   :  { %v892_v56 = vunpack.i.h.bf16 %v890_v50  ;;  %v891_v58 = vunpack.i.l.bf16 %v890_v50  ;;  %v887_v59 = vunpack.i.h.bf16 %v885_v51  ;;  %v886_v60 = vunpack.i.l.bf16 %v885_v51  ;;  %vm1292_vm3 = vmand %vm56_vm12, %vm1722_vm15 }
  0x91   :  { %759 = vmatpush1.bf16.msk.msra.mxu0 %vm1206_vm14, %v757_v52  ;;  %780 = vmatprep.subr.msk.bf16.mxu1 %vm1215_vm6, %v778_v53  ;;  %v781_v61 = vpack.c.bf16 %v117_v55, %v100_v54  ;;  %vm1721_vm7 = vcmp.lt.s32.totalorder %v1146_v10, 15  ;;  %vm1726_vm4 = vcmp.lt.s32.totalorder %v1152_v17, 15  ;;  %vm1308_vm12 = vmpackc.low %vm1758_vm2, %vm1271_vm8  ;;  %v1762_v31 = vmov 0 }
  0x92   :  { %v133_v14 = vsel %vm1721_vm7, %v891_v58, %v892_v56  ;;  %v134_v15 = vsel %vm1721_vm7, %v887_v59, %v891_v58  ;;  %v135_v16 = vsel %vm1721_vm7, %v886_v60, %v887_v59  ;;  %v136_v23 = vsel %vm1721_vm7, %v892_v56, %v886_v60 }
  0x93   :  { %783 = vmatpush1.bf16.msk.msra.mxu1 %vm1248_vm13, %v781_v61  ;;  %v900_v3 = vpop.permute.xlu1 %899  ;;  %v895_v5 = vpop.permute.xlu0 %894  ;;  %v1760_v26 = vsel %vm1308_vm12, 4294967295, %v1759_v26  ;;  %vm1761_vm7 = vcmp.ge.s32.totalorder %v1158_v20, 1  ;;  %vm1764_vm2 = vcmp.ge.s32.totalorder %v1172_v25, 1  ;;  %v1765_v40 = vmov 0 }
  0x94   :  { %v902_v8 = vunpack.i.h.bf16 %v900_v3  ;;  %v901_v9 = vunpack.i.l.bf16 %v900_v3  ;;  %v897_v11 = vunpack.i.h.bf16 %v895_v5  ;;  %v896_v12 = vunpack.i.l.bf16 %v895_v5  ;;  %vm1324_vm8 = vmpackc.low %vm1761_vm7, %vm1283_vm1 }
  0x95   :  { %v1763_v31 = vsel %vm1324_vm8, 4294967295, %v1762_v31  ;;  %vm1332_vm15 = vmpackc.low %vm1764_vm2, %vm1292_vm3  ;;  %vm1063_vm1 = vmmov 1   ;;  %vm1767_vm7 = vcmp.lt.s32.totalorder %v1154_v18, 15  ;;  %v1768_v46 = vmov 0 }
  0x96   :  { %v150_v27 = vsel %vm1723_vm5, %v901_v9, %v902_v8  ;;  %v151_v28 = vsel %vm1723_vm5, %v897_v11, %v901_v9  ;;  %v152_v29 = vsel %vm1723_vm5, %v896_v12, %v897_v11  ;;  %v153_v30 = vsel %vm1723_vm5, %v902_v8, %v896_v12  ;;  %vm1339_vm5 = vmpackc.low %vm1767_vm7, %vm1063_vm1 }
  0x97   :  { %v784_v32 = vpack.c.bf16 %v150_v27, %v133_v14  ;;  %v760_v33 = vpack.c.bf16 %v152_v29, %v135_v16  ;;  %v763_v34 = vpack.c.bf16 %v153_v30, %v136_v23  ;;  %v787_v36 = vpack.c.bf16 %v151_v28, %v134_v15  ;;  %v910_v37 = vpop.permute.xlu1 %909  ;;  %v905_v38 = vpop.permute.xlu0 %904 }
  0x98   :  { %v1766_v40 = vsel %vm1332_vm15, 4294967295, %v1765_v40  ;;  %v912_v41 = vunpack.i.h.bf16 %v910_v37  ;;  %v911_v42 = vunpack.i.l.bf16 %v910_v37  ;;  %v907_v43 = vunpack.i.h.bf16 %v905_v38 }
  0x99   :  { %v906_v45 = vunpack.i.l.bf16 %v905_v38  ;;  %v1769_v46 = vsel %vm1339_vm5, 4294967295, %v1768_v46  ;;  %762 = vmatprep.subr.msk.bf16.mxu0 %vm1262_vm9, %v760_v33  ;;  %786 = vmatprep.subr.msk.bf16.mxu1 %vm1308_vm12, %v784_v32  ;;  %vm1770_vm3 = vcmp.lt.s32.totalorder %v1162_v22, 15  ;;  %v1771_v47 = vmov 0 }
  0x9a   :  { %vm1350_vm2 = vmpackc.low %vm1770_vm3, %vm1063_vm1  ;;  %v167_v48 = vsel %vm1725_vm10, %v911_v42, %v912_v41  ;;  %v168_v49 = vsel %vm1725_vm10, %v907_v43, %v911_v42  ;;  %765 = vmatpush1.bf16.msk.msra.mxu0 %vm1324_vm8, %v763_v34  ;;  %vm1773_vm7 = vcmp.ge.s32.totalorder %v1154_v18, 1  ;;  %789 = vmatpush1.bf16.msk.msra.mxu1 %vm1332_vm15, %v787_v36  ;;  %v1777_v60 = vmov 0 }
  0x9b   :  { %v1772_v47 = vsel %vm1350_vm2, 4294967295, %v1771_v47  ;;  %v169_v50 = vsel %vm1725_vm10, %v906_v45, %v907_v43  ;;  %v170_v51 = vsel %vm1725_vm10, %v912_v41, %v906_v45  ;;  %vm1369_vm3 = vmand %vm1726_vm4, %vm1773_vm7  ;;  %v793_v53 = vpack.c.bf16 %v167_v48, %v1111_v2  ;;  %v920_v58 = vpop.permute.xlu1 %919  ;;  %v915_v59 = vpop.permute.xlu0 %914 }
  0x9c   :  { %v766_v54 = vpack.c.bf16 %v168_v49, %v1109_v1  ;;  %v769_v55 = vpack.c.bf16 %v169_v50, %v1107_v0  ;;  %v790_v56 = vpack.c.bf16 %v170_v51, %v1115_v4  ;;  %vm1776_vm10 = vcmp.lt.s32.totalorder %v1158_v20, 15  ;;  %vm1389_vm4 = vmpackc.low %vm1779_vm0, %vm1063_vm1 }
  0x9d   :  { %vm1382_vm7 = vmpackc.low %vm1776_vm10, %vm1063_vm1  ;;  %v1780_v61 = vmov 0  ;;  %v922_v63 = vunpack.i.h.bf16 %v920_v58  ;;  %v921_v3 = vunpack.i.l.bf16 %v920_v58  ;;  %v917_v5 = vunpack.i.h.bf16 %v915_v59 }
  0x9e   :  { %v1778_v60 = vsel %vm1382_vm7, 4294967295, %v1777_v60  ;;  %v1781_v61 = vsel %vm1389_vm4, 4294967295, %v1780_v61  ;;  %v916_v7 = vunpack.i.l.bf16 %v915_v59  ;;  %768 = vmatprep.subr.msk.bf16.mxu0 %vm1339_vm5, %v766_v54  ;;  %792 = vmatprep.subr.msk.bf16.mxu1 %vm1350_vm2, %v790_v56  ;;  %vm1782_vm0 = vcmp.lt.s32.totalorder %v1152_v17, 15 }
  0x9f   :  { %vm1403_vm10 = vmpackc.low %vm1782_vm0, %vm1369_vm3  ;;  %v1783_v8 = vmov 0  ;;  %771 = vmatpush1.bf16.msk.msra.mxu0 %vm1382_vm7, %v769_v55  ;;  %vm1785_vm15 = vcmp.ge.s32.totalorder %v1162_v22, 1  ;;  %vm1786_vm12 = vcmp.lt.s32.totalorder %v1160_v21, 15  ;;  %795 = vmatpush1.bf16.msk.msra.mxu1 %vm1389_vm4, %v793_v53  ;;  %v930_v11 = vpop.permute.xlu1 %929  ;;  %v925_v12 = vpop.permute.xlu0 %924  ;;  %vm1789_vm0 = vcmp.ge.s32.totalorder %v1158_v20, 1  ;;  %v86_v55 = vld [vmem:[%s1708_s1] sm:$0xff] }
  0xa0   :  { %v1784_v8 = vsel %vm1403_vm10, 4294967295, %v1783_v8  ;;  %vm1414_vm5 = vmand %vm1786_vm12, %vm1785_vm15  ;;  %vm1790_vm1 = vcmp.lt.s32.totalorder %v1156_v19, 15  ;;  %v932_v14 = vunpack.i.h.bf16 %v930_v11  ;;  %v931_v15 = vunpack.i.l.bf16 %v930_v11 }
  0xa1   :  { %vm1425_vm7 = vmand %vm1790_vm1, %vm1789_vm0  ;;  %v927_v16 = vunpack.i.h.bf16 %v925_v12  ;;  %v926_v23 = vunpack.i.l.bf16 %v925_v12  ;;  %vm1793_vm15 = vcmp.ge.s32.totalorder %v1172_v25, 1  ;;  %vm1794_vm12 = vcmp.lt.s32.totalorder %v1170_v24, 15 }
  0xa2   :  { %vm1433_vm4 = vmand %vm1794_vm12, %vm1793_vm15  ;;  %vm1797_vm3 = vcmp.lt.s32.totalorder %v1146_v10, 113  ;;  %vm1801_vm8 = vcmp.lt.s32.totalorder %v1160_v21, 15  ;;  %v1802_v33 = vmov 0  ;;  %vm1804_vm12 = vcmp.lt.s32.totalorder %v1146_v10, 112 }
  0xa3   :  { %v184_v28 = vsel %vm1797_vm3, %v921_v3, %v922_v63  ;;  %vm1798_vm1 = vmmov %vm1797_vm3  ;;  %v201_v34 = vsel %vm1804_vm12, %v931_v15, %v932_v14  ;;  %v1809_v41 = vmov 0  ;;  %v212_v49 = vpop.permute.xlu1 %211  ;;  %v210_v50 = vpop.permute.xlu0 %209  ;;  %v1812_v51 = vmov 0 }
  0xa4   :  { %v185_v29 = vsel %vm1798_vm1, %v917_v5, %v921_v3  ;;  %vm1799_vm0 = vmmov %vm1798_vm1  ;;  %v799_v42 = vpack.c.bf16 %v201_v34, %v184_v28 }
  0xa5   :  { %v186_v30 = vsel %vm1799_vm0, %v916_v7, %v917_v5  ;;  %vm1800_vm2 = vmmov %vm1799_vm0 }
  0xa6   :  { %v187_v32 = vsel %vm1800_vm2, %v922_v63, %v916_v7  ;;  %vm1449_vm15 = vmpackc.low %vm1801_vm8, %vm1414_vm5  ;;  %vm1808_vm2 = vcmp.lt.s32.totalorder %v1156_v19, 15  ;;  %vm1811_vm8 = vcmp.lt.s32.totalorder %v1170_v24, 15 }
  0xa7   :  { %v1803_v33 = vsel %vm1449_vm15, 4294967295, %v1802_v33  ;;  %vm1805_vm3 = vmmov %vm1804_vm12 }
  0xa8   :  { %v202_v36 = vsel %vm1805_vm3, %v927_v16, %v931_v15  ;;  %vm1806_vm1 = vmmov %vm1805_vm3  ;;  %vm1814_vm3 = vcmp.lt.s32.totalorder %v1154_v18, 15  ;;  %v216_v18 = vpop.permute.xlu1 %215 }
  0xa9   :  { %v203_v37 = vsel %vm1806_vm1, %v926_v23, %v927_v16  ;;  %vm1807_vm0 = vmmov %vm1806_vm1  ;;  %v772_v43 = vpack.c.bf16 %v202_v36, %v185_v29  ;;  %v89_v16 = vld [vmem:[%s1711_s4] sm:$0xff] }
  0xaa   :  { %v204_v38 = vsel %vm1807_vm0, %v932_v14, %v926_v23  ;;  %vm1465_vm5 = vmpackc.low %vm1808_vm2, %vm1425_vm7  ;;  %v775_v45 = vpack.c.bf16 %v203_v37, %v186_v30  ;;  %vm1815_vm7 = vcmp.lt.s32.totalorder %v1152_v17, 15  ;;  %vm1818_vm0 = vcmp.lt.s32.totalorder %v1162_v22, 15 }
  0xab   :  { %v1810_v41 = vsel %vm1465_vm5, 4294967295, %v1809_v41  ;;  %v796_v48 = vpack.c.bf16 %v204_v38, %v187_v32  ;;  %vm1473_vm12 = vmpackc.low %vm1811_vm8, %vm1433_vm4  ;;  %774 = vmatprep.subr.msk.bf16.mxu0 %vm1403_vm10, %v772_v43  ;;  %vm1819_vm4 = vcmp.lt.s32.totalorder %v1160_v21, 15  ;;  %v214_v21 = vpop.permute.xlu0 %213 }
  0xac   :  { %v1813_v51 = vsel %vm1473_vm12, 4294967295, %v1812_v51  ;;  %vm1481_vm1 = vmand %vm1815_vm7, %vm1814_vm3  ;;  %777 = vmatpush1.bf16.msk.msra.mxu0 %vm1465_vm5, %v775_v45  ;;  %vm1822_vm3 = vcmp.lt.s32.totalorder %v1158_v20, 15  ;;  %vm1823_vm7 = vcmp.lt.s32.totalorder %v1156_v19, 15 }
  0xad   :  { %798 = vmatprep.subr.msk.bf16.mxu1 %vm1449_vm15, %v796_v48  ;;  %vm1493_vm2 = vmand %vm1819_vm4, %vm1818_vm0  ;;  %vm1826_vm0 = vcmp.lt.s32.totalorder %v1172_v25, 15 }
  0xae   :  { %801 = vmatpush1.bf16.msk.msra.mxu1 %vm1473_vm12, %v799_v42  ;;  %vm1506_vm15 = vmand %vm1823_vm7, %vm1822_vm3  ;;  %vm1830_vm12 = vcmp.lt.s32.totalorder %v1146_v10, 111  ;;  %vm231_vm7 = vcmask 588800  }
  0xaf   :  { %vm1827_vm4 = vmmov %vm1811_vm8  ;;  %v221_v54 = vsel %vm1830_vm12, %v216_v18, %v210_v50 }
  0xb0   :  { %vm1514_vm8 = vmand %vm1827_vm4, %vm1826_vm0  ;;  %717 = vmatprep.subr.msk.mxu1 %vm1493_vm2, %v221_v54 }
  0xb1   :  { %vm1831_vm5 = vmmov %vm1830_vm12  ;;  %vm1836_vm12 = vcmp.lt.s32.totalorder %v1146_v10, 15 }
  0xb2   :  { %v218_v19 = vsel %vm1831_vm5, %v214_v21, %v216_v18  ;;  %vm1832_vm3 = vmmov %vm1831_vm5  ;;  %vm1835_vm5 = vcmp.lt.s32.totalorder %v1146_v10, 17 }
  0xb3   :  { %v219_v20 = vsel %vm1832_vm3, %v212_v49, %v214_v21  ;;  %vm1833_vm10 = vmmov %vm1832_vm3  ;;  %718 = vmatpush1.msk.msra.mxu1 %vm1514_vm8, %v218_v19 }
  0xb4   :  { %v220_v24 = vsel %vm1833_vm10, %v210_v50, %v212_v49  ;;  %700 = vmatprep.subr.msk.mxu0 %vm1481_vm1, %v219_v20  ;;  %719 = vmatmul.mubr.msk.f32.vlgmr.msra.gmra.mrb[0].mxu1 %vm231_vm7, %v86_v55  ;;  %vm1834_vm10 = vcmp.lt.s32.totalorder %v1146_v10, 16  ;;  %vm1837_vm0 = vmmov %vm1835_vm5 }
  0xb5   :  { %701 = vmatpush1.msk.msra.mxu0 %vm1506_vm15, %v220_v24  ;;  %652 = vmatprep.mubr.f32.mxu1 %v1059_v6  ;;  %vm1838_vm4 = vmmov %vm1837_vm0 }
  0xb6   :  { %702 = vmatmul.mubr.msk.f32.vlgmr.msra.gmra.mrb[0].mxu0 %vm231_vm7, %v86_v55  ;;  %vm1839_vm3 = vmmov %vm1837_vm0 }
  0xb7   :  { %581 = vmatprep.mubr.f32.mxu0 %v1059_v6 }
  0xb8   :  { %v229_v25 = vpop.permute.xlu0 %228 }
 0x187   :  { %v372_v58 = vpop.f32.mrb[0].mxu1 }
 0x188   :  { %v374_v3 = vpop.f32.mrb[1].mxu1  ;;  %v373_v5 = vadd.f32 %v372_v58, %v229_v25 }
 0x189   :  { %v301_v56 = vpop.f32.mrb[0].mxu0  ;;  %v375_v9 = vadd.f32 %v374_v3, %v229_v25 }
 0x18a   :  { %v302_v59 = vadd.f32 %v301_v56, %v229_v25  ;;  %v303_v63 = vpop.f32.mrb[1].mxu0  ;;  %v1545_v13 = vmax.f32 %v373_v5, 0.0 }
 0x18b   :  { %v304_v7 = vadd.f32 %v303_v63, %v229_v25  ;;  %v1547_v14 = vmax.f32 %v375_v9, 0.0 }
 0x18c   :  { %v1541_v11 = vmax.f32 %v302_v59, 0.0 }
 0x18d   :  { %v1543_v12 = vmax.f32 %v304_v7, 0.0  ;;  %v939_v15 = vpack.i.bf16 %v1547_v14, %v1545_v13 }
 0x18f   :  { %v944_v6 = vpack.i.bf16 %v1543_v12, %v1541_v11 }
 0x191   :  { %945 = vrot.lane.b32.xlu0 %v944_v6, %s1053_s30  ;;  %935 = vrot.lane.b32.xlu1 %v944_v6, %s1054_s6 }
 0x195   :  { %955 = vrot.lane.b32.xlu0 %v944_v6, %s1055_s0  ;;  %940 = vrot.lane.b32.xlu1 %v939_v15, %s1054_s6 }
 0x199   :  { %965 = vrot.lane.b32.xlu0 %v944_v6, %s1056_s7  ;;  %950 = vrot.lane.b32.xlu1 %v939_v15, %s1053_s30 }
 0x19d   :  { %975 = vrot.lane.b32.xlu0 %v944_v6, %s1057_s8  ;;  %960 = vrot.lane.b32.xlu1 %v939_v15, %s1055_s0 }
 0x1a1   :  { %985 = vrot.lane.b32.xlu0 %v944_v6, %s1058_s9  ;;  %970 = vrot.lane.b32.xlu1 %v939_v15, %s1056_s7 }
 0x1a5   :  { %995 = vrot.lane.b32.xlu0 %v944_v6, %s1061_s10  ;;  %980 = vrot.lane.b32.xlu1 %v939_v15, %s1057_s8 }
 0x1a9   :  { %493 = vrot.lane.b32.xlu0 %v1541_v11, %s1062_s11  ;;  %990 = vrot.lane.b32.xlu1 %v939_v15, %s1058_s9 }
 0x1ad   :  { %497 = vrot.lane.b32.xlu0 %v1545_v13, %s1062_s11  ;;  %1000 = vrot.lane.b32.xlu1 %v939_v15, %s1061_s10 }
 0x1b1   :  { %511 = vperm.xlu0 %933, %v89_v16   ;;  %495 = vrot.lane.b32.xlu1 %v1543_v12, %s1062_s11 }
 0x1b5   :  { %499 = vrot.lane.b32.xlu1 %v1547_v14, %s1062_s11 }
 0x203   :  { %v946_v23 = vpop.permute.xlu0 %945  ;;  %v936_v27 = vpop.permute.xlu1 %935 }
 0x204   :  { %v948_v28 = vunpack.i.h.bf16 %v946_v23  ;;  %v947_v29 = vunpack.i.l.bf16 %v946_v23  ;;  %v938_v30 = vunpack.i.h.bf16 %v936_v27  ;;  %v937_v32 = vunpack.i.l.bf16 %v936_v27 }
 0x206   :  { %v407_v34 = vsel %vm1834_vm10, %v947_v29, %v948_v28  ;;  %v391_v36 = vsel %vm1835_vm5, %v937_v32, %v938_v30  ;;  %vm1841_vm5 = vmmov %vm1834_vm10 }
 0x207   :  { %v802_v37 = vpack.c.bf16 %v407_v34, %v391_v36  ;;  %v956_v38 = vpop.permute.xlu0 %955  ;;  %v941_v42 = vpop.permute.xlu1 %940 }
 0x208   :  { %v958_v43 = vunpack.i.h.bf16 %v956_v38  ;;  %v957_v45 = vunpack.i.l.bf16 %v956_v38  ;;  %v943_v48 = vunpack.i.h.bf16 %v941_v42  ;;  %v942_v49 = vunpack.i.l.bf16 %v941_v42 }
 0x209   :  { %804 = vmatprep.subr.msk.bf16.mxu0 %vm1198_vm11, %v802_v37  ;;  %vm1840_vm11 = vcmp.lt.s32.totalorder %v1146_v10, 1 }
 0x20a   :  { %v423_v55 = vsel %vm1836_vm12, %v957_v45, %v958_v43  ;;  %v389_v24 = vsel %vm1837_vm0, %v942_v49, %v943_v48  ;;  %v390_v25 = vsel %vm1838_vm4, %v938_v30, %v942_v49  ;;  %v392_v56 = vsel %vm1839_vm3, %v943_v48, %v937_v32  ;;  %vm1842_vm12 = vmmov %vm1841_vm5 }
 0x20b   :  { %v966_v50 = vpop.permute.xlu0 %965  ;;  %v951_v18 = vpop.permute.xlu1 %950  ;;  %vm1843_vm0 = vcmp.lt.s32.totalorder %v1146_v10, 15  ;;  %vm1849_vm3 = vcmp.lt.s32.totalorder %v1146_v10, 127 }
 0x20c   :  { %v968_v21 = vunpack.i.h.bf16 %v966_v50  ;;  %v967_v54 = vunpack.i.l.bf16 %v966_v50  ;;  %v953_v19 = vunpack.i.h.bf16 %v951_v18  ;;  %v952_v20 = vunpack.i.l.bf16 %v951_v18 }
 0x20e   :  { %v439_v35 = vsel %vm1840_vm11, %v967_v54, %v968_v21  ;;  %v408_v58 = vsel %vm1834_vm10, %v953_v19, %v947_v29  ;;  %v405_v59 = vsel %vm1841_vm5, %v952_v20, %v953_v19  ;;  %v406_v63 = vsel %vm1842_vm12, %v948_v28, %v952_v20  ;;  %vm1852_vm5 = vmmov %vm1849_vm3 }
 0x20f   :  { %v808_v3 = vpack.c.bf16 %v439_v35, %v423_v55  ;;  %v805_v5 = vpack.c.bf16 %v408_v58, %v392_v56  ;;  %v826_v7 = vpack.c.bf16 %v405_v59, %v389_v24  ;;  %v829_v9 = vpack.c.bf16 %v406_v63, %v390_v25  ;;  %v976_v6 = vpop.permute.xlu0 %975  ;;  %v961_v15 = vpop.permute.xlu1 %960  ;;  %vm1853_vm12 = vmmov %vm1849_vm3 }
 0x210   :  { %v963_v16 = vunpack.i.h.bf16 %v961_v15  ;;  %v962_v23 = vunpack.i.l.bf16 %v961_v15  ;;  %v978_v32 = vunpack.i.h.bf16 %v976_v6  ;;  %v977_v34 = vunpack.i.l.bf16 %v976_v6 }
 0x211   :  { %807 = vmatpush1.bf16.msk.msra.mxu0 %vm1206_vm14, %v805_v5  ;;  %828 = vmatprep.subr.msk.bf16.mxu1 %vm1215_vm6, %v826_v7  ;;  %vm1844_vm14 = vmmov %vm1843_vm0  ;;  %vm1851_vm10 = vnez %v1760_v26 }
 0x212   :  { %810 = vmatprep.subr.msk.bf16.mxu0 %vm1262_vm9, %v808_v3  ;;  %831 = vmatpush1.bf16.msk.msra.mxu1 %vm1248_vm13, %v829_v9  ;;  %v424_v36 = vsel %vm1843_vm0, %v963_v16, %v957_v45  ;;  %v421_v39 = vsel %vm1844_vm14, %v962_v23, %v963_v16  ;;  %vm1845_vm6 = vmmov %vm1843_vm0  ;;  %v455_v18 = vsel %vm1849_vm3, %v977_v34, %v978_v32 }
 0x213   :  { %v986_v27 = vpop.permute.xlu0 %985  ;;  %v971_v28 = vpop.permute.xlu1 %970  ;;  %v422_v44 = vsel %vm1845_vm6, %v958_v43, %v962_v23  ;;  %vm1846_vm9 = vmmov %vm1840_vm11  ;;  %vm1850_vm11 = vnez %v1763_v31  ;;  %vm1855_vm14 = vnez %v1766_v40  ;;  %v817_v24 = vpack.c.bf16 %v455_v18, %v1541_v11 }
 0x214   :  { %v973_v29 = vunpack.i.h.bf16 %v971_v28  ;;  %v972_v30 = vunpack.i.l.bf16 %v971_v28  ;;  %vm1847_vm13 = vmmov %vm1846_vm9  ;;  %vm1856_vm6 = vnez %v1769_v46  ;;  %v988_v40 = vunpack.i.h.bf16 %v986_v27 }
 0x215   :  { %vm1848_vm4 = vmmov %vm1846_vm9 }
 0x216   :  { %v440_v62 = vsel %vm1846_vm9, %v973_v29, %v967_v54  ;;  %v437_v57 = vsel %vm1847_vm13, %v972_v30, %v973_v29  ;;  %v438_v37 = vsel %vm1848_vm4, %v968_v21, %v972_v30  ;;  %vm1854_vm0 = vmmov %vm1849_vm3  ;;  %vm1857_vm9 = vnez %v1772_v47  ;;  %v88_v30 = vld [vmem:[%s1710_s3] sm:$0xff]  ;;  %s1064_s3 = smov [#allocation5]  }
 0x217   :  { %v811_v38 = vpack.c.bf16 %v440_v62, %v424_v36  ;;  %v832_v42 = vpack.c.bf16 %v437_v57, %v421_v39  ;;  %v835_v48 = vpack.c.bf16 %v438_v37, %v422_v44  ;;  %v981_v49 = vpop.permute.xlu1 %980  ;;  %v996_v19 = vpop.permute.xlu0 %995  ;;  %vm1858_vm13 = vnez %v1778_v60  ;;  %s677_s17 = sshll.u32 %s1064_s3, 4  ;;  %s678_s17 = int_to_ptr.vmem [resolvable:$true] %s677_s17 }
 0x218   :  { %v983_v45 = vunpack.i.h.bf16 %v981_v49  ;;  %v982_v50 = vunpack.i.l.bf16 %v981_v49  ;;  %v998_v25 = vunpack.i.h.bf16 %v996_v19  ;;  %v997_v56 = vunpack.i.l.bf16 %v996_v19  ;;  %s1026_s18 = scalar_lea.vmem %s678_s17, 512  ;;  %p1031_p9 = scmp.lt.s32.totalorder %s678_s17, %s678_s17 }
 0x219   :  { %813 = vmatpush1.bf16.msk.msra.mxu0 %vm1850_vm11, %v811_v38  ;;  %834 = vmatprep.subr.msk.bf16.mxu1 %vm1851_vm10, %v832_v42  ;;  %vm1859_vm4 = vnez %v1781_v61  ;;  %vm1860_vm3 = vcmp.lt.s32.totalorder %v1146_v10, 112  ;;  %vm1861_vm11 = vcmp.lt.s32.totalorder %v1146_v10, 113  ;;  %p1027_p8 = scmp.ne.s32.totalorder %s678_s17, %s1026_s18  ;;  %p1032_p10 = scmp.lt.s32.totalorder %s1026_s18, %s1026_s18 }
 0x21a   :  { %v456_v43 = vsel %vm1852_vm5, %v983_v45, %v977_v34  ;;  %v453_v21 = vsel %vm1853_vm12, %v982_v50, %v983_v45  ;;  %v454_v54 = vsel %vm1854_vm0, %v978_v32, %v982_v50  ;;  %837 = vmatpush1.bf16.msk.msra.mxu1 %vm1855_vm14, %v835_v48  ;;  %v487_v63 = vsel %vm1860_vm3, %v997_v56, %v998_v25  ;;  %vm1862_vm10 = vmmov %vm1861_vm11 }
 0x21b   :  { %v838_v20 = vpack.c.bf16 %v456_v43, %v1547_v14  ;;  %v814_v31 = vpack.c.bf16 %v454_v54, %v1543_v12  ;;  %v841_v55 = vpack.c.bf16 %v453_v21, %v1545_v13  ;;  %v991_v26 = vpop.permute.xlu1 %990  ;;  %v987_v12 = vunpack.i.l.bf16 %v986_v27  ;;  %v494_v13 = vpop.permute.xlu0 %493  ;;  %vm1863_vm5 = vmmov %vm1862_vm10  ;;  %p1033_p11 = por %p1032_p10, %p1031_p9 }
 0x21c   :  { %v993_v35 = vunpack.i.h.bf16 %v991_v26  ;;  %v992_v58 = vunpack.i.l.bf16 %v991_v26  ;;  %vm1864_vm12 = vmmov %vm1860_vm3 }
 0x21d   :  { %816 = vmatprep.subr.msk.bf16.mxu0 %vm1856_vm6, %v814_v31  ;;  %840 = vmatprep.subr.msk.bf16.mxu1 %vm1857_vm9, %v838_v20  ;;  %vm1865_vm0 = vmmov %vm1860_vm3  ;;  %vm1868_vm9 = vnez %v1784_v8  ;;  %vm1871_vm3 = vnez %v1810_v41  ;;  %p1034_p12 = pnand %p1033_p11, %p1027_p8 }
 0x21e   :  { %819 = vmatpush1.bf16.msk.msra.mxu0 %vm1858_vm13, %v817_v24  ;;  %843 = vmatpush1.bf16.msk.msra.mxu1 %vm1859_vm4, %v841_v55  ;;  %v472_v46 = vsel %vm1861_vm11, %v993_v35, %v987_v12  ;;  %v469_v47 = vsel %vm1862_vm10, %v992_v58, %v993_v35  ;;  %v470_v60 = vsel %vm1863_vm5, %v988_v40, %v992_v58  ;;  %vm1866_vm14 = vmmov %vm1865_vm0  ;;  %vm1870_vm4 = vcmp.lt.s32.totalorder %v1146_v10, 111 }
 0x21f   :  { %v1001_v11 = vpop.permute.xlu1 %1000  ;;  %vm1867_vm6 = vmmov %vm1863_vm5  ;;  %v498_v27 = vpop.permute.xlu0 %497  ;;  %vm1869_vm13 = vnez %v1803_v33  ;;  %vm1872_vm11 = vnez %v1813_v51 }
 0x220   :  { %v1003_v14 = vunpack.i.h.bf16 %v1001_v11  ;;  %v1002_v59 = vunpack.i.l.bf16 %v1001_v11  ;;  %v471_v7 = vsel %vm1867_vm6, %v987_v12, %v988_v40  ;;  %vm1873_vm10 = vmmov %vm1870_vm4 }
 0x221   :  { %v823_v23 = vpack.c.bf16 %v487_v63, %v471_v7  ;;  %vm1874_vm5 = vmmov %vm1870_vm4 }
 0x222   :  { %v488_v61 = vsel %vm1864_vm12, %v1003_v14, %v997_v56  ;;  %v485_v3 = vsel %vm1865_vm0, %v1002_v59, %v1003_v14  ;;  %v486_v5 = vsel %vm1866_vm14, %v998_v25, %v1002_v59  ;;  %vm1875_vm12 = vmmov %vm1870_vm4 }
 0x223   :  { %v820_v9 = vpack.c.bf16 %v486_v5, %v470_v60  ;;  %v844_v6 = vpack.c.bf16 %v488_v61, %v472_v46  ;;  %v847_v15 = vpack.c.bf16 %v485_v3, %v469_v47  ;;  %v496_v16 = vpop.permute.xlu1 %495 }
 0x224   :  { %v502_v28 = vsel %vm1870_vm4, %v496_v16, %v498_v27  ;;  %v503_v41 = vsel %vm1875_vm12, %v494_v13, %v496_v16 }
 0x225   :  { %822 = vmatprep.subr.msk.bf16.mxu0 %vm1868_vm9, %v820_v9  ;;  %846 = vmatprep.subr.msk.bf16.mxu1 %vm1869_vm13, %v844_v6 }
 0x226   :  { %825 = vmatpush1.bf16.msk.msra.mxu0 %vm1871_vm3, %v823_v23  ;;  %849 = vmatpush1.bf16.msk.msra.mxu1 %vm1872_vm11, %v847_v15 }
 0x227   :  { %v500_v29 = vpop.permute.xlu1 %499  ;;  %734 = vmatprep.subr.msk.mxu0 %vm1481_vm1, %v502_v28 }
 0x228   :  { %v501_v8 = vsel %vm1873_vm10, %v498_v27, %v500_v29  ;;  %v504_v33 = vsel %vm1874_vm5, %v500_v29, %v494_v13 }
 0x229   :  { %751 = vmatprep.subr.msk.mxu1 %vm1493_vm2, %v504_v33 }
 0x22a   :  { %735 = vmatpush1.msk.msra.mxu0 %vm1506_vm15, %v503_v41  ;;  %752 = vmatpush1.msk.msra.mxu1 %vm1514_vm8, %v501_v8 }
 0x22b   :  { %736 = vmatmul.mubr.msk.f32.vlgmr.msra.gmra.mrb[2].mxu0 %vm231_vm7, %v88_v30  ;;  %753 = vmatmul.mubr.msk.f32.vlgmr.msra.gmra.mrb[2].mxu1 %vm231_vm7, %v88_v30 }
 0x230   :  { %v512_v51 = vpop.permute.xlu0 %511 }
 0x2fe   :  { %v583_v52 = vpop.f32.mrb[2].mxu0  ;;  %v654_v32 = vpop.f32.mrb[2].mxu1 }
 0x2ff   :  { %v584_v34 = vadd.f32 %v583_v52, %v512_v51  ;;  %v655_v36 = vadd.f32 %v654_v32, %v512_v51  ;;  %v585_v10 = vpop.f32.mrb[3].mxu0  ;;  %v656_v39 = vpop.f32.mrb[3].mxu1 }
 0x300   :  { %v586_v44 = vadd.f32 %v585_v10, %v512_v51  ;;  %v657_v53 = vadd.f32 %v656_v39, %v512_v51 }
 0x301   :  { %v659_v62 = vadd.f32 %v584_v34, %v1107_v0  ;;  %v661_v17 = vadd.f32 %v655_v36, %v1111_v2 }
 0x302   :  { %v660_v22 = vadd.f32 %v586_v44, %v1109_v1  ;;  %v662_v57 = vadd.f32 %v657_v53, %v1115_v4 }
 0x303   :  { %v663_v37 = vmax.f32 %v659_v62, 0.0  ;;  %v665_v38 = vmax.f32 %v661_v17, 0.0 }
 0x304   :  { %v664_v42 = vmax.f32 %v660_v22, 0.0  ;;  %v666_v48 = vmax.f32 %v662_v57, 0.0 }
 0x305   :  { %667 = vst [vmem:[#allocation5] sm:$0xff] %v663_v37  ;;  %669 = vst [vmem:[#allocation5 + $0x10] sm:$0xff] %v665_v38 }
 0x306   :  { %668 = vst [vmem:[#allocation5 + $0x8] sm:$0xff] %v664_v42  ;;  %670 = vst [vmem:[#allocation5 + $0x18] sm:$0xff] %v666_v48 }
 0x307   :  { %1037 = shalt.err (!%p1034_p12)
}
 0x308   :  { %s1038_s21 = scalar_lea.hbm %s1712_s5, 512 }
 0x309   :  { %p1039_p13 = scmp.ne.s32.totalorder %s1712_s5, %s1038_s21  ;;  %p1042_p0 = scmp.lt.u32.totalorder %s1038_s21, %s1712_s5 }
 0x30b   :  { %p1044_p1 = pnand %p1042_p0, %p1039_p13 }
 0x30d   :  { %1047 = shalt.err (!%p1044_p1)
}
 0x30e   :  { %680 = dma.vmem_to_hbm [thread:$0]  %s678_s17, 512, %s1712_s5, [#allocation4]  }
 0x30f   :  { %1050 = dma.done.wait [#allocation4], 512  }
 0x310   :  { %1051 = vsyncadd [#allocation4], 4294966784 }
 0x311   :  { %684 = vsyncpa [#allocation3], 1 }
 0x312   :  { %685 = vsyncpa [#allocation4], 1 }

</bundles_post_ra>
